<compile_context>
chip_gen: v5e
topology: v5e:2x2
jax: 0.10.0
libtpu: 0.0.40
codegen_flags: <defaults>
</compile_context>

<pallas_src>
import math
import functools

import jax
import jax.numpy as jnp
from jax import lax
from jax.experimental import pallas as pl
from jax.experimental.pallas import tpu as pltpu


_VMEM_LIMIT = 64 * 1024 * 1024  # scoped VMEM budget; actual tile footprints << this


# ------------------------------ tiling helpers ------------------------------


def _sublane_multiple(dtype):
    """Native sublane packing: 8 for 32-bit, 16 for bf16, 32 for 8-bit dtypes."""
    bits = jnp.dtype(dtype).itemsize * 8
    return max(8, 256 // bits)


def _pick_tile(dim, target, multiple):
    """Largest divisor of `dim` that is <= target and a multiple of `multiple`.

    Falls back to the full dimension (always a legal block size) when no such
    divisor exists, so grids divide evenly and no padded garbage enters the
    K-accumulation or the softmax denominators.
    """
    if dim <= target:
        return dim
    t = (target // multiple) * multiple
    while t >= multiple:
        if dim % t == 0:
            return t
        t -= multiple
    return dim


def _heads_per_block(heads, dim_head):
    """Smallest head group so the block's last dim (hp*dim_head) is lane-dense."""
    for hp in range(1, heads + 1):
        if heads % hp == 0 and (hp * dim_head) % 128 == 0:
            return hp
    return heads  # block covers the full inner dim -> also a legal block size


# ----------------------------- Pallas kernels ------------------------------


def _fused_linear_kernel(x_ref, *refs, n_out, scales):
    """y_i = scale_i * (x @ w_i) for n_out weights sharing the same x tile."""
    w_refs = refs[:n_out]
    o_refs = refs[n_out:2 * n_out]
    acc_refs = refs[2 * n_out:]
    kk = pl.program_id(2)

    @pl.when(kk == 0)
    def _():
        for acc in acc_refs:
            acc[...] = jnp.zeros_like(acc)

    x = x_ref[...]
    for w_ref, acc in zip(w_refs, acc_refs):
        acc[...] += jnp.dot(x, w_ref[...], preferred_element_type=jnp.float32)

    @pl.when(kk == pl.num_programs(2) - 1)
    def _():
        for o_ref, acc, s in zip(o_refs, acc_refs, scales):
            r = acc[...]
            if s != 1.0:
                r = r * s           # VPU mul hidden in MXU slack (finalize only)
            o_ref[...] = r.astype(o_ref.dtype)


def _linear_bias_kernel(x_ref, w_ref, b_ref, o_ref, acc_ref):
    """o = x @ w + b, K-accumulated in an f32 VMEM scratch."""
    kk = pl.program_id(2)

    @pl.when(kk == 0)
    def _():
        acc_ref[...] = jnp.zeros_like(acc_ref)

    acc_ref[...] += jnp.dot(x_ref[...], w_ref[...],
                            preferred_element_type=jnp.float32)

    @pl.when(kk == pl.num_programs(2) - 1)
    def _():
        o_ref[...] = (acc_ref[...] + b_ref[...].astype(jnp.float32)).astype(o_ref.dtype)


def _flash_attn_kernel(q_ref, k_ref, v_ref, o_ref, m_sc, l_sc, acc_sc, *, hp, dh):
    """Flash attention over a head-group of `hp` heads; reduction over the KV axis.

    Blocks are (1, tq, hp*dh) / (1, tk, hp*dh), i.e. lane-dense when hp*dh is a
    multiple of 128.  Softmax state (m, l) is kept per head; the f32 accumulator
    and the final store cover the whole lane-dense head group.  The softmax scale
    is already folded into the Q projection output.
    """
    ki = pl.program_id(3)

    @pl.when(ki == 0)
    def _():
        m_sc[...] = jnp.full_like(m_sc, -jnp.inf)
        l_sc[...] = jnp.zeros_like(l_sc)
        acc_sc[...] = jnp.zeros_like(acc_sc)

    q = q_ref[0]                                   # (tq, hp*dh)
    k = k_ref[0]                                   # (tk, hp*dh)
    v = v_ref[0]                                   # (tk, hp*dh)

    for h in range(hp):                            # static, small (typically 2)
        lo, hi = h * dh, (h + 1) * dh
        qh = q[:, lo:hi]                           # (tq, dh)
        kh = k[:, lo:hi]                           # (tk, dh)
        vh = v[:, lo:hi]                           # (tk, dh)

        # s = q @ k^T without materializing the transpose (contract last axes -> MXU).
        s = lax.dot_general(qh, kh, (((1,), (1,)), ((), ())),
                            preferred_element_type=jnp.float32)       # (tq, tk)

        m_prev = m_sc[h]                                               # (tq, 1)
        m_new = jnp.maximum(m_prev, jnp.max(s, axis=-1, keepdims=True))
        alpha = jnp.exp(m_prev - m_new)
        p = jnp.exp(s - m_new)                                         # (tq, tk)
        l_sc[h] = alpha * l_sc[h] + jnp.sum(p, axis=-1, keepdims=True)
        acc_sc[:, lo:hi] = alpha * acc_sc[:, lo:hi] + jnp.dot(
            p.astype(vh.dtype), vh, preferred_element_type=jnp.float32)
        m_sc[h] = m_new

    @pl.when(ki == pl.num_programs(3) - 1)
    def _():
        parts = []
        for h in range(hp):
            lo, hi = h * dh, (h + 1) * dh
            inv_l = pl.reciprocal(l_sc[h], approx=True)                # EUP slot
            parts.append(acc_sc[:, lo:hi] * inv_l)
        # single lane-dense store of the whole head group
        o_ref[0] = jnp.concatenate(parts, axis=-1).astype(o_ref.dtype)


# ----------------------------- Pallas wrappers ------------------------------


def pallas_fused_linear(x, weights, scales=None, *,
                        tm_target=256, tn_target=1536, tk_target=512):
    """x: (R, K); weights: tuple of (K, C) -> tuple of (R, C).

    Reads each x tile from HBM once for all outputs; tn covers the full output
    width where possible so the x tile is never re-read across output columns.
    """
    R, K = x.shape
    C = weights[0].shape[1]
    assert all(w.shape == (K, C) for w in weights)
    n_out = len(weights)
    if scales is None:
        scales = (1.0,) * n_out
    scales = tuple(float(s) for s in scales)

    sub = _sublane_multiple(x.dtype)
    tm = _pick_tile(R, tm_target, sub)
    tn = _pick_tile(C, tn_target, 128)
    tk = _pick_tile(K, tk_target, 128)
    grid = (R // tm, C // tn, K // tk)

    itemsize = x.dtype.itemsize
    cost = pl.CostEstimate(
        flops=int(2 * R * C * K * n_out),
        transcendentals=0,
        bytes_accessed=int((R * K + n_out * (K * C + R * C)) * itemsize),
    )

    kernel = functools.partial(_fused_linear_kernel, n_out=n_out, scales=scales)
    return pl.pallas_call(
        kernel,
        out_shape=tuple(jax.ShapeDtypeStruct((R, C), x.dtype) for _ in range(n_out)),
        grid=grid,
        in_specs=[pl.BlockSpec((tm, tk), lambda i, j, k: (i, k))]
                + [pl.BlockSpec((tk, tn), lambda i, j, k: (k, j)) for _ in range(n_out)],
        out_specs=tuple(pl.BlockSpec((tm, tn), lambda i, j, k: (i, j))
                        for _ in range(n_out)),
        scratch_shapes=[pltpu.VMEM((tm, tn), jnp.float32) for _ in range(n_out)],
        compiler_params=pltpu.CompilerParams(
            dimension_semantics=("parallel", "parallel", "arbitrary"),
            vmem_limit_bytes=_VMEM_LIMIT),
        cost_estimate=cost,
    )(x, *weights)


def pallas_linear_bias(x, w, b, *, tm_target=256, tn_target=1536, tk_target=512):
    """x: (R, K), w: (K, C), b: (1, C) -> (R, C); tiled + K-accumulated."""
    R, K = x.shape
    _, C = w.shape

    sub = _sublane_multiple(x.dtype)
    tm = _pick_tile(R, tm_target, sub)
    tn = _pick_tile(C, tn_target, 128)
    tk = _pick_tile(K, tk_target, 128)
    grid = (R // tm, C // tn, K // tk)

    itemsize = x.dtype.itemsize
    cost = pl.CostEstimate(
        flops=int(2 * R * C * K),
        transcendentals=0,
        bytes_accessed=int((R * K + K * C + R * C + C) * itemsize),
    )

    return pl.pallas_call(
        _linear_bias_kernel,
        out_shape=jax.ShapeDtypeStruct((R, C), x.dtype),
        grid=grid,
        in_specs=[
            pl.BlockSpec((tm, tk), lambda i, j, k: (i, k)),
            pl.BlockSpec((tk, tn), lambda i, j, k: (k, j)),
            pl.BlockSpec((1, tn), lambda i, j, k: (0, j)),
        ],
        out_specs=pl.BlockSpec((tm, tn), lambda i, j, k: (i, j)),
        scratch_shapes=[pltpu.VMEM((tm, tn), jnp.float32)],
        compiler_params=pltpu.CompilerParams(
            dimension_semantics=("parallel", "parallel", "arbitrary"),
            vmem_limit_bytes=_VMEM_LIMIT),
        cost_estimate=cost,
    )(x, w, b)


def pallas_flash_attention(q, k, v, heads, dim_head, *, kv_repeat=1,
                           tq_target=512, tk_target=1024):
    """q: (B, N, H*dh), k/v: (B, M, H*dh) -> (B, N, H*dh).

    Heads are indexed via the BlockSpec last-dim block index (no XLA head
    split/merge transposes), grouped so blocks are lane-dense.  `kv_repeat=n`
    implements the crossframe path: the K/V source batch is (b // n) * n, read
    directly through the index_map instead of materializing a repeated K/V.
    """
    B, N, inner = q.shape
    Bk, M, _ = k.shape
    assert inner == heads * dim_head

    hp = _heads_per_block(heads, dim_head)
    hg = heads // hp
    hpd = hp * dim_head
    if hpd > 512:                      # rare fallback (odd head counts): bound VMEM
        tq_target = min(tq_target, 256)
        tk_target = min(tk_target, 512)

    sub = _sublane_multiple(q.dtype)
    tq = _pick_tile(N, tq_target, sub)
    tk = _pick_tile(M, tk_target, 128)
    if tk == M and M > tk_target:      # ragged context: retry with sublane multiple
        tk = _pick_tile(M, tk_target, sub)
    grid = (B, hg, N // tq, M // tk)

    itemsize = q.dtype.itemsize
    cost = pl.CostEstimate(
        flops=int(4 * B * heads * N * M * dim_head),
        transcendentals=int(B * heads * N * M),
        bytes_accessed=int((2 * B * N * inner + 2 * Bk * M * inner) * itemsize),
    )

    kernel = functools.partial(_flash_attn_kernel, hp=hp, dh=dim_head)
    return pl.pallas_call(
        kernel,
        out_shape=jax.ShapeDtypeStruct((B, N, inner), q.dtype),
        grid=grid,
        in_specs=[
            pl.BlockSpec((1, tq, hpd), lambda b, h, qi, ki: (b, qi, h)),
            pl.BlockSpec((1, tk, hpd),
                         lambda b, h, qi, ki: ((b // kv_repeat) * kv_repeat, ki, h)),
            pl.BlockSpec((1, tk, hpd),
                         lambda b, h, qi, ki: ((b // kv_repeat) * kv_repeat, ki, h)),
        ],
        out_specs=pl.BlockSpec((1, tq, hpd), lambda b, h, qi, ki: (b, qi, h)),
        scratch_shapes=[
            pltpu.VMEM((hp, tq, 1), jnp.float32),    # running max m (per head)
            pltpu.VMEM((hp, tq, 1), jnp.float32),    # running denom l (per head)
            pltpu.VMEM((tq, hpd), jnp.float32),      # output accumulator (lane-dense)
        ],
        compiler_params=pltpu.CompilerParams(
            dimension_semantics=("parallel", "parallel", "parallel", "arbitrary"),
            vmem_limit_bytes=_VMEM_LIMIT),
        cost_estimate=cost,
    )(q, k, v)


# ----------------------------- Module forward ------------------------------


def init_params(key, query_dim, context_dim, heads, dim_head, dtype=jnp.float32):
    """Deterministic synthetic parameters (shapes from the module __init__)."""
    inner = heads * dim_head
    context_dim = query_dim if context_dim is None else context_dim
    k1, k2, k3, k4, k5 = jax.random.split(key, 5)
    s = 0.05
    return {
        # stored as (in_dim, out_dim) == W^T of the PyTorch nn.Linear weight
        "wq": (s * jax.random.normal(k1, (query_dim, inner))).astype(dtype),
        "wk": (s * jax.random.normal(k2, (context_dim, inner))).astype(dtype),
        "wv": (s * jax.random.normal(k3, (context_dim, inner))).astype(dtype),
        "wo": (s * jax.random.normal(k4, (inner, query_dim))).astype(dtype),
        "bo": (s * jax.random.normal(k5, (1, query_dim))).astype(dtype),
    }


def memory_efficient_cross_attention(
    x,
    params,
    heads,
    dim_head,
    context=None,
    mask=None,
    additional_tokens=None,
    n_times_crossframe_attn_in_self=0,
    compute_dtype=None,
):
    """Forward pass matching MemoryEfficientCrossAttention.forward.

    x: (B, N, query_dim); context: (B, M, context_dim) or None.
    compute_dtype=jnp.bfloat16 casts MXU inputs to bf16 (f32 accumulation stays
    in the kernels) — recommended on v6e/v7x.  Dropout is identity (dropout=0.0
    / eval); mask raises NotImplementedError like the PyTorch module.
    """
    if mask is not None:
        raise NotImplementedError
    if additional_tokens is not None:
        n_tokens_to_mask = additional_tokens.shape[1]
        x = jnp.concatenate([additional_tokens, x], axis=1)

    B, N, Dq = x.shape
    inner = heads * dim_head
    scale = 1.0 / math.sqrt(dim_head)

    wq, wk, wv = params["wq"], params["wk"], params["wv"]
    wo, bo = params["wo"], params["bo"]
    if compute_dtype is not None:
        x = x.astype(compute_dtype)
        if context is not None:
            context = context.astype(compute_dtype)
        wq, wk, wv = (w.astype(compute_dtype) for w in (wq, wk, wv))
        wo, bo = wo.astype(compute_dtype), bo.astype(compute_dtype)

    x2d = x.reshape(B * N, Dq)
    if context is None:
        # Self-attention: fused Q/K/V projection -> activation read from HBM once.
        # The softmax scale is applied to the Q accumulator in the kernel finalize.
        q2d, k2d, v2d = pallas_fused_linear(x2d, (wq, wk, wv),
                                            scales=(scale, 1.0, 1.0))
        M = N
    else:
        _, M, Dc = context.shape
        ctx2d = context.reshape(B * M, Dc)
        (q2d,) = pallas_fused_linear(x2d, (wq,), scales=(scale,))
        k2d, v2d = pallas_fused_linear(ctx2d, (wk, wv))    # fused K/V projection

    # (row-major reshapes only — no head split transpose, no HBM round trip)
    q = q2d.reshape(B, N, inner)
    k = k2d.reshape(B, M, inner)
    v = v2d.reshape(B, M, inner)

    kv_repeat = 1
    if n_times_crossframe_attn_in_self:
        assert B % n_times_crossframe_attn_in_self == 0
        # Do NOT materialize repeat(k[::n], n): the flash K/V index_map reads the
        # shared source batch ((b // n) * n) directly.
        kv_repeat = n_times_crossframe_attn_in_self

    out = pallas_flash_attention(q, k, v, heads, dim_head, kv_repeat=kv_repeat)

    out2d = pallas_linear_bias(out.reshape(B * N, inner), wo, bo)
    out = out2d.reshape(B, N, Dq)

    if additional_tokens is not None:
        out = out[:, n_tokens_to_mask:]
    # nn.Dropout(0.0) is identity.
    return out


# ------------------------------ JAX reference -------------------------------


def reference_forward(x, params, heads, dim_head, context=None,
                      n_times_crossframe_attn_in_self=0):
    B, N, _ = x.shape
    ctx = x if context is None else context
    inner = heads * dim_head
    q = x @ params["wq"]
    k = ctx @ params["wk"]
    v = ctx @ params["wv"]

    if n_times_crossframe_attn_in_self:
        n = n_times_crossframe_attn_in_self
        k = jnp.repeat(k[::n], n, axis=0)
        v = jnp.repeat(v[::n], n, axis=0)

    def split(t):
        b, L, _ = t.shape
        return t.reshape(b, L, heads, dim_head).transpose(0, 2, 1, 3)

    qh, kh, vh = split(q), split(k), split(v)
    s = jnp.einsum("bhqd,bhkd->bhqk", qh, kh) / math.sqrt(dim_head)
    p = jax.nn.softmax(s, axis=-1)
    o = jnp.einsum("bhqk,bhkd->bhqd", p, vh)
    o = o.transpose(0, 2, 1, 3).reshape(B, N, inner)
    return o @ params["wo"] + params["bo"]


# --------------------------------- Demo ------------------------------------

if __name__ == "__main__":
    key = jax.random.PRNGKey(0)
    kx, kc, kp, kp2 = jax.random.split(key, 4)

    # Small shapes consistent with the module's forward.
    B = 2
    N = 16          # query sequence length
    M = 8           # context sequence length
    query_dim = 32
    context_dim = 16
    heads = 4
    dim_head = 8

    x = jax.random.normal(kx, (B, N, query_dim), dtype=jnp.float32)
    context = jax.random.normal(kc, (B, M, context_dim), dtype=jnp.float32)

    # Cross-attention path (separate Q projection + fused K/V projection).
    params = init_params(kp, query_dim, context_dim, heads, dim_head)
    out = memory_efficient_cross_attention(x, params, heads, dim_head, context=context)
    out = jax.block_until_ready(out)
    ref = reference_forward(x, params, heads, dim_head, context=context)
    assert out.shape == (B, N, query_dim), out.shape
    assert jnp.all(jnp.isfinite(out))
    assert jnp.allclose(out, ref, rtol=2e-2, atol=2e-2)

    # Self-attention path (fused Q/K/V projection, context=None).
    params_self = init_params(kp2, query_dim, None, heads, dim_head)
    out_self = memory_efficient_cross_attention(x, params_self, heads, dim_head,
                                                context=None)
    out_self = jax.block_until_ready(out_self)
    ref_self = reference_forward(x, params_self, heads, dim_head, context=None)
    assert out_self.shape == (B, N, query_dim), out_self.shape
    assert jnp.all(jnp.isfinite(out_self))
    assert jnp.allclose(out_self, ref_self, rtol=2e-2, atol=2e-2)

    # Crossframe self-attention path (shared K/V read via index_map, no repeat).
    out_cf = memory_efficient_cross_attention(x, params_self, heads, dim_head,
                                              context=None,
                                              n_times_crossframe_attn_in_self=2)
    out_cf = jax.block_until_ready(out_cf)
    ref_cf = reference_forward(x, params_self, heads, dim_head, context=None,
                               n_times_crossframe_attn_in_self=2)
    assert out_cf.shape == (B, N, query_dim), out_cf.shape
    assert jnp.all(jnp.isfinite(out_cf))
    assert jnp.allclose(out_cf, ref_cf, rtol=2e-2, atol=2e-2)

    # bf16 MXU-input path (v6e/v7x throughput mode); f32 accumulation in-kernel.
    out_bf16 = memory_efficient_cross_attention(x, params, heads, dim_head,
                                                context=context,
                                                compute_dtype=jnp.bfloat16)
    out_bf16 = jax.block_until_ready(out_bf16)
    assert out_bf16.shape == (B, N, query_dim), out_bf16.shape
    assert jnp.all(jnp.isfinite(out_bf16.astype(jnp.float32)))
    assert jnp.allclose(out_bf16.astype(jnp.float32), ref, rtol=1e-1, atol=1e-1)

    print("KERNEL_OK")
</pallas_src>

<mosaic_0001>
module attributes {stable_mosaic.version = 11 : i64} {
  func.func @_fused_linear_kernel(%arg0: i32, %arg1: i32, %arg2: i32, %arg3: memref<32x32xf32, #tpu.memory_space<vmem>>, %arg4: memref<32x32xf32, #tpu.memory_space<vmem>>, %arg5: memref<32x32xf32, #tpu.memory_space<vmem>>, %arg6: memref<32x32xf32, #tpu.memory_space<vmem>>) attributes {dimension_semantics = [#tpu.dimension_semantics<parallel>, #tpu.dimension_semantics<parallel>, #tpu.dimension_semantics<arbitrary>], iteration_bounds = array<i64: 1, 1, 1>, scalar_prefetch = 0 : i64, scratch_operands = 1 : i64, tpu.core_type = #tpu.core_type<tc>, window_params = [{transform_indices = @transform_0, window_bounds = array<i64: 32, 32>}, {transform_indices = @transform_1, window_bounds = array<i64: 32, 32>}, {transform_indices = @transform_2, window_bounds = array<i64: 32, 32>}]} {
    %c0_i32 = arith.constant 0 : i32
    %0 = arith.cmpi eq, %arg2, %c0_i32 : i32
    %1 = arith.extui %0 : i1 to i32
    %c0_i32_0 = arith.constant 0 : i32
    %2 = arith.cmpi ne, %1, %c0_i32_0 : i32
    scf.if %2 {
      %cst_10 = arith.constant 0.000000e+00 : f32
      %12 = vector.broadcast %cst_10 : f32 to vector<32x32xf32>
      %c0_11 = arith.constant 0 : index
      %c0_12 = arith.constant 0 : index
      %13 = vector.load %arg6[%c0_11, %c0_12] : memref<32x32xf32, #tpu.memory_space<vmem>>, vector<32x32xf32>
      tpu.vector_store %arg6[%c0_11, %c0_12], %12 {strides = array<i32>} : memref<32x32xf32, #tpu.memory_space<vmem>>, vector<32x32xf32>,
    } else {
    }
    %c0 = arith.constant 0 : index
    %c0_1 = arith.constant 0 : index
    %3 = vector.load %arg3[%c0, %c0_1] : memref<32x32xf32, #tpu.memory_space<vmem>>, vector<32x32xf32>
    %c0_2 = arith.constant 0 : index
    %c0_3 = arith.constant 0 : index
    %4 = vector.load %arg6[%c0_2, %c0_3] : memref<32x32xf32, #tpu.memory_space<vmem>>, vector<32x32xf32>
    %c0_4 = arith.constant 0 : index
    %c0_5 = arith.constant 0 : index
    %5 = vector.load %arg4[%c0_4, %c0_5] : memref<32x32xf32, #tpu.memory_space<vmem>>, vector<32x32xf32>
    %cst = arith.constant dense<0.000000e+00> : vector<32x32xf32>
    %6 = tpu.matmul %3, %5, %cst {dimension_numbers = #tpu.dot_dimension_numbers<[1], [0], [0], [1], [0, 0, 1, 1], [], []>} : vector<32x32xf32>, vector<32x32xf32>, vector<32x32xf32> -> vector<32x32xf32>
    %7 = arith.addf %4, %6 : vector<32x32xf32>
    %c0_6 = arith.constant 0 : index
    %c0_7 = arith.constant 0 : index
    %8 = vector.load %arg6[%c0_6, %c0_7] : memref<32x32xf32, #tpu.memory_space<vmem>>, vector<32x32xf32>
    tpu.vector_store %arg6[%c0_6, %c0_7], %7 {strides = array<i32>} : memref<32x32xf32, #tpu.memory_space<vmem>>, vector<32x32xf32>,
    %c0_i32_8 = arith.constant 0 : i32
    %9 = arith.cmpi eq, %arg2, %c0_i32_8 : i32
    %10 = arith.extui %9 : i1 to i32
    %c0_i32_9 = arith.constant 0 : i32
    %11 = arith.cmpi ne, %10, %c0_i32_9 : i32
    scf.if %11 {
      %c0_10 = arith.constant 0 : index
      %c0_11 = arith.constant 0 : index
      %12 = vector.load %arg6[%c0_10, %c0_11] : memref<32x32xf32, #tpu.memory_space<vmem>>, vector<32x32xf32>
      %cst_12 = arith.constant 0.353553385 : f32
      %13 = vector.broadcast %cst_12 : f32 to vector<32x32xf32>
      %14 = arith.mulf %12, %13 : vector<32x32xf32>
      %c0_13 = arith.constant 0 : index
      %c0_14 = arith.constant 0 : index
      %15 = vector.load %arg5[%c0_13, %c0_14] : memref<32x32xf32, #tpu.memory_space<vmem>>, vector<32x32xf32>
      tpu.vector_store %arg5[%c0_13, %c0_14], %14 {strides = array<i32>} : memref<32x32xf32, #tpu.memory_space<vmem>>, vector<32x32xf32>,
    } else {
    }
    return
  }
  func.func @transform_0(%arg0: i32, %arg1: i32, %arg2: i32) -> (i32, i32) {
    %c0_i32 = arith.constant 0 : i32
    return %arg0, %arg2 : i32, i32
  }
  func.func @transform_1(%arg0: i32, %arg1: i32, %arg2: i32) -> (i32, i32) {
    %c0_i32 = arith.constant 0 : i32
    return %arg2, %arg1 : i32, i32
  }
  func.func @transform_2(%arg0: i32, %arg1: i32, %arg2: i32) -> (i32, i32) {
    %c0_i32 = arith.constant 0 : i32
    return %arg0, %arg1 : i32, i32
  }
}

</mosaic_0001>

<bundles_post_ra>
// kernel: tpu_custom_call.1
= control target key start
LH: loop header
LB: loop body
LE: loop exit
PB: predicated region body
PF: predicated region fallthrough
CT: control target
= control target key end

     0   :  { %7 = vsyncpa [#allocation4], 0  ;;  %s305_s0 = inlined_call_operand.hbm [shape: f32[32,32], index: 0, kind: input, shape index: {}]   ;;  %s306_s1 = inlined_call_operand.hbm [shape: f32[32,32], index: 1, kind: input, shape index: {}]   ;;  %s307_s2 = inlined_call_operand.hbm [shape: f32[32,32], index: 2, kind: output, shape index: {}]  }
   0x1   :  { %8 = vsyncpa [#allocation7], 0 }
   0x2   :  { %9 = vsyncpa [#allocation5], 0  ;;  %s14_s11 = sshll.u32 %s305_s0, 4  ;;  %s250_s12 = smov [#allocation3]   ;;  %s15_s11 = int_to_ptr.hbm [resolvable:$true] %s14_s11 }
   0x3   :  { %s16_s13 = sshll.u32 %s250_s12, 4  ;;  %s27_s16 = sshll.u32 %s306_s1, 4  ;;  %s17_s13 = int_to_ptr.vmem [resolvable:$true] %s16_s13  ;;  %s28_s16 = int_to_ptr.hbm [resolvable:$true] %s27_s16 }
   0x4   :  { %s251_s17 = smov 128   ;;  %s252_s18 = smov 8  }
   0x5   :  { %22 = dma.hbm_to_vmem [thread:$0]  %s15_s11, 512, %s17_s13, [#allocation4], %s251_s17, %s251_s17, %s252_s18  }
   0x6   :  { %s253_s19 = smov [#allocation6]  }
   0x7   :  { %s29_s20 = sshll.u32 %s253_s19, 4  ;;  %s30_s20 = int_to_ptr.vmem [resolvable:$true] %s29_s20 }
   0x8   :  { %35 = dma.hbm_to_vmem [thread:$0]  %s28_s16, 512, %s30_s20, [#allocation7], %s251_s17, %s251_s17, %s252_s18  }
   0x9   :  { %244 = dma.done.wait [#allocation4], 512  }
   0xa   :  { %245 = vsyncadd [#allocation4], 4294966784 }
   0xb   :  { %246 = dma.done.wait [#allocation7], 512  }
   0xc   :  { %247 = vsyncadd [#allocation7], 4294966784  ;;  %vm48_vm0 = vcmask 261120   ;;  %v254_v0 = vmov 0.0   ;;  %v64_v1 = vld [vmem:[#allocation6 + $0x18] sm:$0xff]  ;;  %v63_v2 = vld [vmem:[#allocation6 + $0x10] sm:$0xff] }
   0xd   :  { %49 = vst.msk [vmem:[#allocation2] sm:$0xff] %vm48_vm0, %v254_v0  ;;  %155 = vmatpush.msra.mxu2 %v64_v1  ;;  %156 = vmatpush.msra.mxu3 %v64_v1  ;;  %v62_v3 = vld [vmem:[#allocation6 + $0x8] sm:$0xff]  ;;  %v61_v4 = vld [vmem:[#allocation6] sm:$0xff]  ;;  %v55_v5 = vld [vmem:[#allocation3 + $0x10] sm:$0xff]  ;;  %s255_s0 = smov [#allocation8]   ;;  %s136_s23 = sshll.u32 %s307_s2, 4  ;;  %s137_s23 = int_to_ptr.hbm [resolvable:$true] %s136_s23 }
   0xe   :  { %50 = vst.msk [vmem:[#allocation2 + $0x8] sm:$0xff] %vm48_vm0, %v254_v0  ;;  %90 = vmatpush.msra.mxu0 %v64_v1  ;;  %154 = vmatpush.msra.mxu1 %v64_v1  ;;  %v56_v6 = vld [vmem:[#allocation3 + $0x18] sm:$0xff]  ;;  %v53_v7 = vld [vmem:[#allocation3] sm:$0xff]  ;;  %v54_v8 = vld [vmem:[#allocation3 + $0x8] sm:$0xff]  ;;  %s134_s1 = sshll.u32 %s255_s0, 4  ;;  %s135_s1 = int_to_ptr.vmem [resolvable:$true] %s134_s1 }
   0xf   :  { %51 = vst.msk [vmem:[#allocation2 + $0x10] sm:$0xff] %vm48_vm0, %v254_v0  ;;  %158 = vmatpush.msra.mxu2 %v63_v2  ;;  %159 = vmatpush.msra.mxu3 %v63_v2 }
  0x10   :  { %52 = vst.msk [vmem:[#allocation2 + $0x18] sm:$0xff] %vm48_vm0, %v254_v0  ;;  %91 = vmatpush.msra.mxu0 %v63_v2  ;;  %157 = vmatpush.msra.mxu1 %v63_v2 }
  0x11   :  { %161 = vmatpush.msra.mxu2 %v62_v3  ;;  %162 = vmatpush.msra.mxu3 %v62_v3 }
  0x12   :  { %92 = vmatpush.msra.mxu0 %v62_v3  ;;  %160 = vmatpush.msra.mxu1 %v62_v3 }
  0x13   :  { %164 = vmatpush.msra.mxu2 %v61_v4  ;;  %165 = vmatpush.msra.mxu3 %v61_v4 }
  0x14   :  { %152 = vmatmul.msk.f32.vlgmr.msra.gmra.mxu2 %vm48_vm0, %v55_v5  ;;  %153 = vmatmul.msk.f32.vlgmr.msra.gmra.mxu3 %vm48_vm0, %v56_v6  ;;  %v57_v9 = vld [vmem:[#allocation2] sm:$0xff] }
  0x15   :  { %93 = vmatpush.msra.mxu0 %v61_v4  ;;  %163 = vmatpush.msra.mxu1 %v61_v4  ;;  %v58_v10 = vld [vmem:[#allocation2 + $0x8] sm:$0xff] }
  0x16   :  { %150 = vmatmul.msk.f32.vlgmr.msra.gmra.mxu0 %vm48_vm0, %v53_v7  ;;  %151 = vmatmul.msk.f32.vlgmr.msra.gmra.mxu1 %vm48_vm0, %v54_v8  ;;  %v59_v15 = vld [vmem:[#allocation2 + $0x10] sm:$0xff] }
  0x17   :  { %v60_v16 = vld [vmem:[#allocation2 + $0x18] sm:$0xff] }
  0x93   :  { %v95_v11 = vpop.f32.mrf.mxu0  ;;  %v98_v12 = vpop.f32.mrf.mxu1 }
  0x94   :  { %v107_v13 = vadd.f32 %v95_v11, %v57_v9  ;;  %v108_v14 = vadd.f32 %v98_v12, %v58_v10 }
  0x96   :  { %111 = vst.msk [vmem:[#allocation2] sm:$0xff] %vm48_vm0, %v107_v13 }
  0x97   :  { %112 = vst.msk [vmem:[#allocation2 + $0x8] sm:$0xff] %vm48_vm0, %v108_v14  ;;  %v101_v17 = vpop.f32.mrf.mxu2  ;;  %v104_v18 = vpop.f32.mrf.mxu3 }
  0x98   :  { %v109_v19 = vadd.f32 %v101_v17, %v59_v15  ;;  %v110_v20 = vadd.f32 %v104_v18, %v60_v16 }
  0x9a   :  { %113 = vst.msk [vmem:[#allocation2 + $0x10] sm:$0xff] %vm48_vm0, %v109_v19 }
  0x9b   :  { %114 = vst.msk [vmem:[#allocation2 + $0x18] sm:$0xff] %vm48_vm0, %v110_v20 }
  0x9d   :  { %v118_v21 = vld [vmem:[#allocation2] sm:$0xff] }
  0x9e   :  { %v119_v22 = vld [vmem:[#allocation2 + $0x8] sm:$0xff]  ;;  %v122_v23 = vmul.f32 0.35355338, %v118_v21 }
  0x9f   :  { %v123_v24 = vmul.f32 0.35355338, %v119_v22 }
  0xa0   :  { %126 = vst.msk [vmem:[#allocation8] sm:$0xff] %vm48_vm0, %v122_v23 }
  0xa1   :  { %v120_v25 = vld [vmem:[#allocation2 + $0x10] sm:$0xff]  ;;  %127 = vst.msk [vmem:[#allocation8 + $0x8] sm:$0xff] %vm48_vm0, %v123_v24 }
  0xa2   :  { %v121_v26 = vld [vmem:[#allocation2 + $0x18] sm:$0xff]  ;;  %v124_v27 = vmul.f32 0.35355338, %v120_v25 }
  0xa3   :  { %v125_v28 = vmul.f32 0.35355338, %v121_v26 }
  0xa4   :  { %128 = vst.msk [vmem:[#allocation8 + $0x10] sm:$0xff] %vm48_vm0, %v124_v27 }
  0xa5   :  { %129 = vst.msk [vmem:[#allocation8 + $0x18] sm:$0xff] %vm48_vm0, %v125_v28 }
  0xa6   :  { %142 = dma.vmem_to_hbm [thread:$0]  %s135_s1, 512, %s137_s23, [#allocation5], %s251_s17, %s251_s17, %s252_s18  }
  0xa7   :  { %248 = dma.done.wait [#allocation5], 512  }
  0xa8   :  { %249 = vsyncadd [#allocation5], 4294966784 }
  0xa9   :  { %147 = vsyncpa [#allocation4], 1 }
  0xaa   :  { %148 = vsyncpa [#allocation7], 1 }
  0xab   :  { %149 = vsyncpa [#allocation5], 1 }

</bundles_post_ra>
